<compile_context>
chip_gen: v5e
topology: v5e:2x2
jax: 0.10.0
libtpu: 0.0.40
codegen_flags: <defaults>
</compile_context>

<pallas_src>
import jax
import jax.numpy as jnp
from jax.experimental import pallas as pl
from jax.experimental.pallas import tpu as pltpu


def _frozen_bn_kernel(x_ref, sb_ref, o_ref):
    # x_ref:  (row_tile, hw_tile)   rows = flattened (n, c) pairs
    # sb_ref: (row_tile, 2) f32     [:, 0] = per-row scale, [:, 1] = per-row bias
    # Edge tiles may carry garbage rows/lanes; elementwise math on them is
    # fine because the corresponding output stores are masked (dropped).
    x = x_ref[...].astype(jnp.float32)
    sb = sb_ref[...]
    y = x * sb[:, 0:1] + sb[:, 1:2]
    o_ref[...] = y.astype(o_ref.dtype)


def _vmem_capacity_bytes():
    try:
        return int(pltpu.get_tpu_info().vmem_capacity_bytes)
    except Exception:
        return 128 * 1024 * 1024   # v5e/v6e physical VMEM fallback


def _round_up(x, m):
    return -(-x // m) * m


def _choose_tiles(nc, hw, itemsize, vmem_cap):
    """Fixed, VMEM-budget-driven tiles (no divisibility search)."""
    # v7x (<=64 MiB VMEM, 3.2 TB/s HBM): bigger blocks amortize the ~0.35us
    # per-grid-step overhead.  v5e/v6e: ~4 MiB blocks already reach ~85% of
    # the HBM roofline.
    if vmem_cap <= 96 * 1024 * 1024:          # v7x-class chip
        target_block_bytes = 8 * 1024 * 1024
        hw_cap = 4096
    else:                                     # v5e / v6e
        target_block_bytes = 4 * 1024 * 1024
        hw_cap = 2048

    hw_pad = _round_up(hw, 128)
    nc_pad = _round_up(nc, 8)

    hw_tile = min(hw_cap, hw_pad)                              # lane-dense, %128
    row_tile = (target_block_bytes // (hw_tile * itemsize)) // 8 * 8
    row_tile = max(8, min(row_tile, nc_pad))                   # %8, <= padded rows

    # Megacore (v7x has 2 TCs): if the whole problem fits a single block,
    # split along HW (keeping each half >=512 lanes) so both cores get work.
    if nc_pad <= row_tile and hw_pad <= hw_tile and hw_pad >= 1024:
        hw_tile = _round_up(hw_pad // 2, 128)

    return row_tile, hw_tile


def frozen_batchnorm2d(x_nchw, gamma, beta, running_mean, running_var,
                       eps=1e-5):
    """Frozen (eval-mode) BatchNorm2d via a tiled Pallas streaming-FMA kernel."""
    N, C, H, W = x_nchw.shape
    dtype = x_nchw.dtype

    # Glue: fold running stats + affine into one f32 scale/bias per channel.
    inv_std = 1.0 / jnp.sqrt(running_var.astype(jnp.float32) + eps)
    scale_c = gamma.astype(jnp.float32) * inv_std                        # (C,)
    bias_c = beta.astype(jnp.float32) - running_mean.astype(jnp.float32) * scale_c

    NC, HW = N * C, H * W
    x_rows = x_nchw.reshape(NC, HW)          # contiguous view of NCHW, no copy
    # Pack per-row scale/bias into one tiny (NC, 2) f32 array (one side DMA).
    sb_rows = jnp.stack([jnp.tile(scale_c, (N,)), jnp.tile(bias_c, (N,))],
                        axis=-1)

    itemsize = jnp.dtype(dtype).itemsize     # real itemsize (bf16 -> 2 rows/block gain)
    vmem_cap = _vmem_capacity_bytes()
    row_tile, hw_tile = _choose_tiles(NC, HW, itemsize, vmem_cap)

    grid = (pl.cdiv(NC, row_tile), pl.cdiv(HW, hw_tile))

    # VMEM budget: double-buffered x + out blocks plus the (lane-padded)
    # scale/bias block, with headroom; capped to 3/4 of physical VMEM.
    block_bytes = row_tile * hw_tile * itemsize
    sb_bytes = row_tile * 128 * 4            # (row_tile, 2) pads to 128 lanes in VMEM
    needed = 2 * (2 * block_bytes + sb_bytes)
    vmem_limit = min(max(needed + 8 * 1024 * 1024, 32 * 1024 * 1024),
                     vmem_cap * 3 // 4)

    out_rows = pl.pallas_call(
        _frozen_bn_kernel,
        out_shape=jax.ShapeDtypeStruct((NC, HW), dtype),
        grid_spec=pltpu.PrefetchScalarGridSpec(
            num_scalar_prefetch=0,
            grid=grid,
            in_specs=[
                pl.BlockSpec((row_tile, hw_tile), lambda i, j: (i, j)),
                pl.BlockSpec((row_tile, 2), lambda i, j: (i, 0)),
            ],
            out_specs=pl.BlockSpec((row_tile, hw_tile), lambda i, j: (i, j)),
        ),
        compiler_params=pltpu.CompilerParams(
            dimension_semantics=("parallel", "parallel"),
            vmem_limit_bytes=int(vmem_limit),
        ),
    )(x_rows, sb_rows)

    return out_rows.reshape(N, C, H, W)


class BatchNormFreezePallas:
    """Mimics fcos BatchNormFreeze wrapping a single BatchNorm2d(C).

    The BatchNorm2d is permanently frozen (eval mode, requires_grad=False),
    so forward always uses running statistics — exactly what the kernel does.
    """

    def __init__(self, num_channels, key):
        k1, k2, k3, k4 = jax.random.split(key, 4)
        # Deterministic synthetic parameters (shapes from nn.BatchNorm2d(C)).
        self.gamma = jax.random.normal(k1, (num_channels,), jnp.float32) * 0.1 + 1.0
        self.beta = jax.random.normal(k2, (num_channels,), jnp.float32) * 0.1
        self.running_mean = jax.random.normal(k3, (num_channels,), jnp.float32)
        self.running_var = jax.nn.softplus(
            jax.random.normal(k4, (num_channels,), jnp.float32)) + 0.5
        self.eps = 1e-5

    def __call__(self, x_nchw):
        # forward(*input) -> self.module(*input); the module is the frozen BN.
        return frozen_batchnorm2d(x_nchw, self.gamma, self.beta,
                                  self.running_mean, self.running_var,
                                  self.eps)

    def train(self, mode=True):
        # BN stays in eval mode regardless — the kernel always uses running
        # statistics (frozen semantics), so nothing to flip.
        # TODO(synk): generic module wrapping / state_dict passthrough is
        # Python-side plumbing with no kernel equivalent.
        return self


def _reference(x, gamma, beta, mean, var, eps):
    # Pure-JAX eval-mode BatchNorm2d reference (NCHW).
    g = gamma[None, :, None, None]
    b = beta[None, :, None, None]
    m = mean[None, :, None, None]
    v = var[None, :, None, None]
    return (x - m) / jnp.sqrt(v + eps) * g + b


if __name__ == "__main__":
    key = jax.random.PRNGKey(0)
    k_x, k_p = jax.random.split(key)

    N, C, H, W = 2, 4, 16, 16
    x = jax.random.normal(k_x, (N, C, H, W), jnp.float32)

    model = BatchNormFreezePallas(C, k_p)
    model.train(True)  # BN stays frozen — same output either way

    out = model(x)
    out = jax.block_until_ready(out)

    ref = _reference(x, model.gamma, model.beta,
                     model.running_mean, model.running_var, model.eps)
    assert out.shape == (N, C, H, W)
    assert jnp.allclose(out, ref, atol=1e-5, rtol=1e-5), "mismatch vs reference"

    # Exercise the ragged-edge (no-pad) path: HW = 14*14 = 196 (not % 128),
    # NC = 3*5 = 15 (not % 8).
    x2 = jax.random.normal(k_x, (3, 5, 14, 14), jnp.float32)
    model2 = BatchNormFreezePallas(5, k_p)
    out2 = jax.block_until_ready(model2(x2))
    ref2 = _reference(x2, model2.gamma, model2.beta,
                      model2.running_mean, model2.running_var, model2.eps)
    assert jnp.allclose(out2, ref2, atol=1e-5, rtol=1e-5), "ragged-path mismatch"

    print("KERNEL_OK")
</pallas_src>

<mosaic_0001>
module attributes {stable_mosaic.version = 11 : i64} {
  func.func @_frozen_bn_kernel(%arg0: i32, %arg1: i32, %arg2: memref<8x256xf32, #tpu.memory_space<vmem>>, %arg3: memref<8x2xf32, #tpu.memory_space<vmem>>, %arg4: memref<8x256xf32, #tpu.memory_space<vmem>>) attributes {dimension_semantics = [#tpu.dimension_semantics<parallel>, #tpu.dimension_semantics<parallel>], iteration_bounds = array<i64: 1, 1>, scalar_prefetch = 0 : i64, scratch_operands = 0 : i64, tpu.core_type = #tpu.core_type<tc>, window_params = [{transform_indices = @transform_0, window_bounds = array<i64: 8, 256>}, {transform_indices = @transform_1, window_bounds = array<i64: 8, 2>}, {transform_indices = @transform_2, window_bounds = array<i64: 8, 256>}]} {
    %c0 = arith.constant 0 : index
    %c0_0 = arith.constant 0 : index
    %0 = vector.load %arg2[%c0, %c0_0] : memref<8x256xf32, #tpu.memory_space<vmem>>, vector<8x256xf32>
    %c0_1 = arith.constant 0 : index
    %c0_2 = arith.constant 0 : index
    %1 = vector.load %arg3[%c0_1, %c0_2] : memref<8x2xf32, #tpu.memory_space<vmem>>, vector<8x2xf32>
    %2 = vector.extract_strided_slice %1 {offsets = [0, 0], sizes = [8, 1], strides = [1, 1]} : vector<8x2xf32> to vector<8x1xf32>
    %3 = vector.broadcast %2 : vector<8x1xf32> to vector<8x256xf32>
    %4 = arith.mulf %0, %3 : vector<8x256xf32>
    %5 = vector.extract_strided_slice %1 {offsets = [0, 1], sizes = [8, 1], strides = [1, 1]} : vector<8x2xf32> to vector<8x1xf32>
    %6 = vector.broadcast %5 : vector<8x1xf32> to vector<8x256xf32>
    %7 = arith.addf %4, %6 : vector<8x256xf32>
    %c0_3 = arith.constant 0 : index
    %c0_4 = arith.constant 0 : index
    %8 = vector.load %arg4[%c0_3, %c0_4] : memref<8x256xf32, #tpu.memory_space<vmem>>, vector<8x256xf32>
    tpu.vector_store %arg4[%c0_3, %c0_4], %7 {strides = array<i32>} : memref<8x256xf32, #tpu.memory_space<vmem>>, vector<8x256xf32>,
    return
  }
  func.func @transform_0(%arg0: i32, %arg1: i32) -> (i32, i32) {
    %c0_i32 = arith.constant 0 : i32
    return %arg0, %arg1 : i32, i32
  }
  func.func @transform_1(%arg0: i32, %arg1: i32) -> (i32, i32) {
    %c0_i32 = arith.constant 0 : i32
    %c0_i32_0 = arith.constant 0 : i32
    return %arg0, %c0_i32 : i32, i32
  }
  func.func @transform_2(%arg0: i32, %arg1: i32) -> (i32, i32) {
    %c0_i32 = arith.constant 0 : i32
    return %arg0, %arg1 : i32, i32
  }
}

</mosaic_0001>

<bundles_post_ra>
// kernel: tpu_custom_call.1
= control target key start
LH: loop header
LB: loop body
LE: loop exit
PB: predicated region body
PF: predicated region fallthrough
CT: control target
= control target key end

     0   :  { %7 = vsyncpa [#allocation3], 0  ;;  %s147_s0 = inlined_call_operand.hbm [shape: f32[8,256], index: 0, kind: input, shape index: {}]   ;;  %s148_s1 = inlined_call_operand.vmem [shape: f32[8,2], index: 1, kind: input, shape index: {}]   ;;  %s149_s2 = inlined_call_operand.hbm [shape: f32[8,256], index: 2, kind: output, shape index: {}]  }
   0x1   :  { %8 = vsyncpa [#allocation4], 0  ;;  %s14_s11 = sshll.u32 %s147_s0, 4  ;;  %s119_s12 = smov [#allocation2]   ;;  %s15_s11 = int_to_ptr.hbm [resolvable:$true] %s14_s11 }
   0x2   :  { %s16_s13 = sshll.u32 %s119_s12, 4  ;;  %s17_s13 = int_to_ptr.vmem [resolvable:$true] %s16_s13 }
   0x3   :  { %19 = dma.hbm_to_vmem [thread:$0]  %s15_s11, 256, %s17_s13, [#allocation3]  }
   0x4   :  { %115 = dma.done.wait [#allocation3], 256  }
   0x5   :  { %116 = vsyncadd [#allocation3], 4294967040  ;;  %v120_v0 = vmov 0   ;;  %v28_v1 = vld [vmem:[%s148_s1] sm:$0xff]  ;;  %v121_v2 = vmov 1   ;;  %v27_v5 = vld [vmem:[#allocation2 + $0x8] sm:$0xff] }
   0x6   :  { %65 = vset.pattern.permute.xlu0 %v120_v0  ;;  %v26_v4 = vld [vmem:[#allocation2] sm:$0xff]  ;;  %s122_s0 = smov [#allocation5]   ;;  %s51_s19 = sshll.u32 %s149_s2, 4  ;;  %s52_s19 = int_to_ptr.hbm [resolvable:$true] %s51_s19 }
   0x7   :  { %31 = vperm.xlu0 %65, %v28_v1   ;;  %s49_s16 = sshll.u32 %s122_s0, 4  ;;  %s50_s16 = int_to_ptr.vmem [resolvable:$true] %s49_s16 }
   0xf   :  { %66 = vset.pattern.permute.xlu0 %v121_v2 }
  0x10   :  { %37 = vperm.xlu0 %66, %v28_v1  }
  0x79   :  { %v32_v3 = vpop.permute.xlu0 %31 }
  0x7a   :  { %v34_v6 = vmul.f32 %v32_v3, %v26_v4  ;;  %v35_v7 = vmul.f32 %v32_v3, %v27_v5 }
  0x82   :  { %v38_v8 = vpop.permute.xlu0 %37 }
  0x83   :  { %v40_v9 = vadd.f32 %v38_v8, %v34_v6  ;;  %v41_v10 = vadd.f32 %v38_v8, %v35_v7 }
  0x85   :  { %42 = vst [vmem:[#allocation5] sm:$0xff] %v40_v9 }
  0x86   :  { %43 = vst [vmem:[#allocation5 + $0x8] sm:$0xff] %v41_v10 }
  0x87   :  { %54 = dma.vmem_to_hbm [thread:$0]  %s50_s16, 256, %s52_s19, [#allocation4]  }
  0x88   :  { %117 = dma.done.wait [#allocation4], 256  }
  0x89   :  { %118 = vsyncadd [#allocation4], 4294967040 }
  0x8a   :  { %59 = vsyncpa [#allocation3], 1 }
  0x8b   :  { %60 = vsyncpa [#allocation4], 1 }

</bundles_post_ra>
